<compile_context>
chip_gen: v6e
topology: v6e:2x2x1
jax: 0.10.0
libtpu: 0.0.40
codegen_flags: <defaults>
</compile_context>

<pallas_src>
import functools
import math

import jax
import jax.numpy as jnp
from jax.experimental import pallas as pl
from jax.experimental.pallas import tpu as pltpu

BN_EPS = 1e-5
ACT_DTYPE = jnp.bfloat16          # inter-layer activation dtype (MXU-native)
VMEM_LIMIT = 32 * 1024 * 1024     # safe on v5e/v6e (128 MiB phys) and v7x (64 MiB phys)

# ResNet-101: Bottleneck blocks per layer and layer strides.
LAYER_CFG = ((64, 3, 1), (128, 4, 2), (256, 23, 2), (512, 3, 2))

_TM_CANDS = (512, 256, 128, 64, 32, 16, 8)


# ----------------------------- small helpers --------------------------------

def _round_up(a, m):
    return (a + m - 1) // m * m


def _pick_mm_tiles(M, K, N, has_res):
    """Choose (tm, Mp, tn).  Pads M only to a multiple of 16 when no candidate
    tile divides it; prefers tn=N so the weight block is grid-invariant
    (fetched from HBM exactly once per kernel)."""
    Mp = M if any(M % t == 0 for t in _TM_CANDS) else _round_up(M, 16)
    tm_max = next(t for t in _TM_CANDS if Mp % t == 0)

    def vmem_bytes(tm, tn):
        n_out = 2 if has_res else 1                    # out (+ residual) tiles
        elems = tm * K + K * tn + n_out * tm * tn
        return 2 * 2 * elems                           # bf16, double-buffered

    budget = 24 << 20
    tn_cands = [N] + [t for t in (512, 256, 128) if N % t == 0 and t < N]
    for tn in tn_cands:
        for tm in _TM_CANDS:
            if tm <= tm_max and Mp % tm == 0 and vmem_bytes(tm, tn) <= budget:
                return tm, Mp, tn
    return tm_max, Mp, tn_cands[-1]                    # small shapes never hit this


def _pick_row_tile(M, C, itemsize=2, max_bytes=2 << 20, max_rows=1024):
    """Row-block for [M, C] elementwise/pool kernels: multiple of 8 dividing M."""
    cap = max(8, min(max_rows, max_bytes // max(1, C * itemsize)))
    cap = min(cap, M)
    for t in range(cap - cap % 8, 7, -8):
        if M % t == 0:
            return t
    return M


def _pick_tr(OH, Wp, Cin):
    """Output-row block for the fused 3x3 conv: divisor of OH, bounded slab size."""
    best = 1
    for t in range(1, OH + 1):
        if OH % t:
            continue
        if t * Wp <= 2048 and (t + 3) * Wp * Cin * 2 <= (3 << 20):
            best = t
    return best


# ----------------------------- Pallas kernels --------------------------------

def _mm_kernel(*refs, relu, has_res):
    """out = act(x @ w + shift [+ residual]); whole K in one block, f32 accumulate."""
    if has_res:
        x_ref, w_ref, sh_ref, r_ref, o_ref = refs
    else:
        x_ref, w_ref, sh_ref, o_ref = refs
    acc = jnp.dot(x_ref[...], w_ref[...], preferred_element_type=jnp.float32)
    y = acc + sh_ref[...]
    if has_res:
        y = y + r_ref[...].astype(jnp.float32)
    if relu:
        y = jnp.maximum(y, 0.0)
    o_ref[...] = y.astype(o_ref.dtype)


def _conv3x3_fused_kernel(x_hbm, w_ref, sh_ref, o_ref, slab, sem,
                          *, wp, ow, tr, cin, nr, hpwp, relu):
    """Fused 3x3 stride-1 pad-1 conv: manual double-buffered DMA of a padded row
    slab, 9 taps folded into the matmul reduction (no materialized im2col).

    The padded image has Hp = H+3 rows (1 top pad, 1 bottom pad, 1 slack row) and
    Wp = round_up(W+2, 8) columns, so every tap slice below is statically in
    bounds and every DMA is a full-slot copy of (tr+3)*Wp rows.
    The double-buffer is primed per image (r == 0), which keeps it valid when the
    batch grid axis is sharded across TensorCores ("parallel")."""
    b = pl.program_id(0)
    r = pl.program_id(1)
    slot = r % 2
    tm = tr * wp                            # matmul M (includes garbage cols per row)
    slab_rows = (tr + 3) * wp
    start = pl.multiple_of(b * hpwp + r * tm, 8)

    def _copy(row0, sl):
        return pltpu.make_async_copy(
            x_hbm.at[pl.ds(row0, slab_rows), :], slab.at[sl], sem.at[sl])

    @pl.when(r == 0)
    def _():                                # prime this image's pipeline
        _copy(start, slot).start()

    @pl.when(r < nr - 1)
    def _():                                # prefetch next row-block (same image)
        _copy(pl.multiple_of(start + tm, 8), 1 - slot).start()

    _copy(start, slot).wait()

    acc = None
    for ki in range(3):
        for kj in range(3):
            a = slab[slot, pl.ds(ki * wp + kj, tm), :]           # shifted tap view
            wk = w_ref[pl.ds((ki * 3 + kj) * cin, cin), :]       # tap's [Cin, Cout]
            p = jnp.dot(a, wk, preferred_element_type=jnp.float32)
            acc = p if acc is None else acc + p

    y = acc + sh_ref[...]
    if relu:
        y = jnp.maximum(y, 0.0)
    cout = y.shape[1]
    # wp is a multiple of 8, so this reshape/slice is sublane-tile aligned:
    # one dense store instead of tr misaligned per-row stores.
    o_ref[0] = y.reshape(tr, wp, cout)[:, :ow, :].astype(o_ref.dtype)


def _max9_kernel(*refs):
    o_ref = refs[-1]
    m = refs[0][...]
    for r in refs[1:-1]:
        m = jnp.maximum(m, r[...])
    o_ref[...] = m


def _avgpool_kernel(x_ref, o_ref):
    o_ref[0] = jnp.mean(x_ref[0].astype(jnp.float32), axis=0, keepdims=True)


# ----------------------------- wrappers --------------------------------------

def matmul_shift_act(x, w, shift, relu, residual=None):
    """y = act(x @ w + shift [+ residual]); x:[M,K] bf16, w:[K,N] bf16, shift:[1,N] f32."""
    M, K = x.shape
    N = w.shape[1]
    has_res = residual is not None
    tm, Mp, tn = _pick_mm_tiles(M, K, N, has_res)
    if Mp != M:                             # ragged fallback: pad only to mult. of 16
        x = jnp.pad(x, ((0, Mp - M), (0, 0)))
        if has_res:
            residual = jnp.pad(residual, ((0, Mp - M), (0, 0)))

    in_specs = [
        pl.BlockSpec((tm, K), lambda i, j: (i, 0)),
        pl.BlockSpec((K, tn), lambda i, j: (0, j)),   # tn=N => grid-invariant weight
        pl.BlockSpec((1, tn), lambda i, j: (0, j)),
    ]
    args = [x, w, shift]
    if has_res:
        in_specs.append(pl.BlockSpec((tm, tn), lambda i, j: (i, j)))
        args.append(residual)

    kernel = functools.partial(_mm_kernel, relu=relu, has_res=has_res)
    out = pl.pallas_call(
        kernel,
        out_shape=jax.ShapeDtypeStruct((Mp, N), ACT_DTYPE),
        grid_spec=pltpu.PrefetchScalarGridSpec(
            num_scalar_prefetch=0,
            grid=(Mp // tm, N // tn),
            in_specs=in_specs,
            out_specs=pl.BlockSpec((tm, tn), lambda i, j: (i, j)),
        ),
        compiler_params=pltpu.CompilerParams(
            dimension_semantics=("parallel", "parallel"),
            vmem_limit_bytes=VMEM_LIMIT),
    )(*args)
    return out[:M] if Mp != M else out


def conv3x3_s1_fused(x, w9, shift, relu=True):
    """3x3 / stride-1 / pad-1 conv + BN shift (+ReLU), no im2col.
    x: [B,H,W,Cin] bf16; w9: [9*Cin, Cout] bf16 (BN scale folded); shift: [1,Cout] f32."""
    B, H, W, Cin = x.shape
    Cout = w9.shape[1]
    OH, OW = H, W
    Wp = _round_up(W + 2, 8)                      # sublane-aligned padded row width
    Hp = H + 3                                    # 1 top pad, 1 bottom pad, 1 slack row
    # TODO(synk): the zero-padding still does one HBM round-trip; in-kernel halo
    #             zeroing + unpadded DMA would remove it.
    xp = jnp.pad(x, ((0, 0), (1, 2), (1, Wp - W - 1), (0, 0)))
    xflat = xp.reshape(B * Hp * Wp, Cin)          # free reshape (contiguous)

    tr = _pick_tr(OH, Wp, Cin)
    nr = OH // tr
    slab_rows = (tr + 3) * Wp                     # covers the tap overhang statically

    kernel = functools.partial(
        _conv3x3_fused_kernel, wp=Wp, ow=OW, tr=tr, cin=Cin,
        nr=nr, hpwp=Hp * Wp, relu=relu)

    return pl.pallas_call(
        kernel,
        out_shape=jax.ShapeDtypeStruct((B, OH, OW, Cout), ACT_DTYPE),
        grid_spec=pltpu.PrefetchScalarGridSpec(
            num_scalar_prefetch=0,
            grid=(B, nr),
            in_specs=[
                pl.BlockSpec(memory_space=pl.ANY),                    # padded input (HBM)
                pl.BlockSpec((9 * Cin, Cout), lambda b, r: (0, 0)),   # full weight, fetched once
                pl.BlockSpec((1, Cout), lambda b, r: (0, 0)),
            ],
            out_specs=pl.BlockSpec((1, tr, OW, Cout), lambda b, r: (b, r, 0, 0)),
            scratch_shapes=[
                pltpu.VMEM((2, slab_rows, Cin), ACT_DTYPE),           # double-buffered slab
                pltpu.SemaphoreType.DMA((2,)),
            ],
        ),
        compiler_params=pltpu.CompilerParams(
            # batch axis parallel (uses both TensorCores on v7x); row axis sequential
            # so the per-image manual double-buffer stays valid.
            dimension_semantics=("parallel", "arbitrary"),
            vmem_limit_bytes=VMEM_LIMIT),
    )(xflat, w9, shift)


def conv_im2col(x, wmat, shift, kh, kw, stride, padding, relu):
    """Conv via im2col + matmul — used only for conv1 (7x7/s2) and the three 3x3/s2 convs.
    # TODO(synk): strided convs still materialize im2col patches in HBM."""
    B, H, W, C = x.shape
    OH = (H + 2 * padding - kh) // stride + 1
    OW = (W + 2 * padding - kw) // stride + 1
    xp = jnp.pad(x, ((0, 0), (padding, padding), (padding, padding), (0, 0)))
    cols = []
    for i in range(kh):
        for j in range(kw):
            cols.append(xp[:, i:i + stride * (OH - 1) + 1:stride,
                           j:j + stride * (OW - 1) + 1:stride, :])
    patches = jnp.concatenate(cols, axis=-1).reshape(B * OH * OW, kh * kw * C)
    out = matmul_shift_act(patches, wmat, shift, relu)
    return out.reshape(B, OH, OW, wmat.shape[1])


def conv1x1(x, wmat, shift, stride, relu, residual=None):
    """1x1 conv + BN shift (+ReLU, + fused residual add)."""
    B, H, W, C = x.shape
    if stride > 1:
        # TODO(synk): strided slice still materializes a copy; could be folded
        #             into the matmul's x BlockSpec index_map.
        x = x[:, ::stride, ::stride, :]
    B, OH, OW, _ = x.shape
    N = wmat.shape[1]
    res2 = None if residual is None else residual.reshape(B * OH * OW, N)
    out = matmul_shift_act(x.reshape(B * OH * OW, C), wmat, shift, relu, residual=res2)
    return out.reshape(B, OH, OW, N)


def maxpool_3x3_s2_p1(x):
    """nn.MaxPool2d(3, stride=2, padding=1), NHWC; gridded over rows.
    # TODO(synk): the 9 tap arrays are still materialized in HBM; a row-slab DMA
    #             kernel would cut the traffic ~4x."""
    B, H, W, C = x.shape
    neg = jnp.finfo(x.dtype).min
    xp = jnp.pad(x, ((0, 0), (1, 1), (1, 1), (0, 0)), constant_values=neg)
    OH = (H + 2 - 3) // 2 + 1
    OW = (W + 2 - 3) // 2 + 1
    M = B * OH * OW
    taps = [xp[:, i:i + 2 * (OH - 1) + 1:2, j:j + 2 * (OW - 1) + 1:2, :]
            .reshape(M, C) for i in range(3) for j in range(3)]
    tr = _pick_row_tile(M, C, itemsize=x.dtype.itemsize)
    out = pl.pallas_call(
        _max9_kernel,
        out_shape=jax.ShapeDtypeStruct((M, C), x.dtype),
        grid_spec=pltpu.PrefetchScalarGridSpec(
            num_scalar_prefetch=0,
            grid=(M // tr,),
            in_specs=[pl.BlockSpec((tr, C), lambda i: (i, 0)) for _ in range(9)],
            out_specs=pl.BlockSpec((tr, C), lambda i: (i, 0)),
        ),
        compiler_params=pltpu.CompilerParams(dimension_semantics=("parallel",)),
    )(*taps)
    return out.reshape(B, OH, OW, C)


def global_avgpool(x):
    """AdaptiveAvgPool2d((1,1)) + flatten -> [B, C] (f32), gridded over batch."""
    B, H, W, C = x.shape
    x2 = x.reshape(B, H * W, C)
    out = pl.pallas_call(
        _avgpool_kernel,
        out_shape=jax.ShapeDtypeStruct((B, 1, C), jnp.float32),
        grid_spec=pltpu.PrefetchScalarGridSpec(
            num_scalar_prefetch=0,
            grid=(B,),
            in_specs=[pl.BlockSpec((1, H * W, C), lambda b: (b, 0, 0))],
            out_specs=pl.BlockSpec((1, 1, C), lambda b: (b, 0, 0)),
        ),
        compiler_params=pltpu.CompilerParams(dimension_semantics=("parallel",)),
    )(x2)
    return out.reshape(B, C)


# ----------------------------- parameters ------------------------------------

def init_resnet101_params(key):
    """Deterministic stand-in weights (raw PyTorch-layout OIHW convs + BN stats)."""
    keys = iter(jax.random.split(key, 256))

    def conv_w(oc, ic, kh, kw):
        fan_in = ic * kh * kw
        return jax.random.normal(next(keys), (oc, ic, kh, kw),
                                 jnp.float32) * math.sqrt(2.0 / fan_in)

    def bn(oc, gamma=1.0):
        return dict(gamma=jnp.full((oc,), gamma, jnp.float32),
                    beta=jnp.zeros((oc,), jnp.float32),
                    mean=jnp.zeros((oc,), jnp.float32),
                    var=jnp.ones((oc,), jnp.float32))

    params = dict(conv1_w=conv_w(64, 3, 7, 7), bn1=bn(64))
    layers = []
    inplanes = 64
    for planes, nblocks, stride in LAYER_CFG:
        blocks = []
        for b in range(nblocks):
            s = stride if b == 0 else 1
            block = dict(
                conv1_w=conv_w(planes, inplanes, 1, 1), bn1=bn(planes),
                conv2_w=conv_w(planes, planes, 3, 3), bn2=bn(planes),
                # small gamma on the last BN keeps the deep residual stack bounded
                conv3_w=conv_w(planes * 4, planes, 1, 1), bn3=bn(planes * 4, gamma=0.2),
            )
            if s != 1 or inplanes != planes * 4:
                block["down_w"] = conv_w(planes * 4, inplanes, 1, 1)
                block["down_bn"] = bn(planes * 4)
            blocks.append(block)
            inplanes = planes * 4
        layers.append(blocks)
    params["layers"] = layers
    return params


def _prep_matmul_weight(w_oihw, bn):
    """Fold BN(eval) scale into the conv weight, transpose to [KH*KW*IC, OC], cast bf16.
    Done once at prep time — no per-forward transpose/reshape of weights."""
    scale = bn["gamma"] / jnp.sqrt(bn["var"] + BN_EPS)
    shift = (bn["beta"] - bn["mean"] * scale).reshape(1, -1)          # f32 epilogue shift
    w = w_oihw * scale[:, None, None, None]
    oc, ic, kh, kw = w.shape
    wmat = jnp.transpose(w, (2, 3, 1, 0)).reshape(kh * kw * ic, oc).astype(ACT_DTYPE)
    return wmat, shift


def prepare_extractor_params(raw):
    prep = dict(conv1=_prep_matmul_weight(raw["conv1_w"], raw["bn1"]))
    layers = []
    for blocks in raw["layers"]:
        pblocks = []
        for blk in blocks:
            p = dict(
                conv1=_prep_matmul_weight(blk["conv1_w"], blk["bn1"]),
                conv2=_prep_matmul_weight(blk["conv2_w"], blk["bn2"]),
                conv3=_prep_matmul_weight(blk["conv3_w"], blk["bn3"]),
            )
            if "down_w" in blk:
                p["down"] = _prep_matmul_weight(blk["down_w"], blk["down_bn"])
            pblocks.append(p)
        layers.append(pblocks)
    prep["layers"] = layers
    return prep


# ----------------------------- ResNet-101 forward ----------------------------

def bottleneck(x, p, stride):
    w1, s1 = p["conv1"]
    w2, s2 = p["conv2"]
    w3, s3 = p["conv3"]
    out = conv1x1(x, w1, s1, stride=1, relu=True)
    if stride == 1:
        out = conv3x3_s1_fused(out, w2, s2, relu=True)
    else:
        out = conv_im2col(out, w2, s2, kh=3, kw=3, stride=stride, padding=1, relu=True)
    if "down" in p:
        wd, sd = p["down"]
        identity = conv1x1(x, wd, sd, stride=stride, relu=False)
    else:
        identity = x
    # conv3 + BN shift + residual add + ReLU fused in one matmul epilogue
    return conv1x1(out, w3, s3, stride=1, relu=True, residual=identity)


def extractor_resnet_forward(prep, x_nchw):
    """ExtractorResNet.forward: [B, 3, H, W] (NCHW) -> [B, 2048]."""
    x = jnp.transpose(x_nchw, (0, 2, 3, 1)).astype(ACT_DTYPE)         # NCHW -> NHWC, bf16
    w1, s1 = prep["conv1"]
    x = conv_im2col(x, w1, s1, kh=7, kw=7, stride=2, padding=3, relu=True)  # conv1+bn1+relu
    x = maxpool_3x3_s2_p1(x)
    for (planes, nblocks, lstride), blocks in zip(LAYER_CFG, prep["layers"]):
        for bi, p in enumerate(blocks):
            x = bottleneck(x, p, stride=(lstride if bi == 0 else 1))
    return global_avgpool(x)                                           # avgpool + view(B, -1)


# ----------------------------- main -------------------------------------------

if __name__ == "__main__":
    key = jax.random.PRNGKey(0)
    pkey, xkey = jax.random.split(key)
    raw = init_resnet101_params(pkey)
    params = prepare_extractor_params(raw)   # one-time: BN fold + layout + bf16 cast

    # Small RGB image batch (NCHW), consistent with the module (needs >= 32x32 spatial).
    x = jax.random.normal(xkey, (2, 3, 64, 64), jnp.float32)

    out = extractor_resnet_forward(params, x)
    out = jax.block_until_ready(out)
    assert out.shape == (2, 2048), out.shape
    assert bool(jnp.all(jnp.isfinite(out))), "non-finite output"
    print("KERNEL_OK")
</pallas_src>

<mosaic_0001>
module attributes {stable_mosaic.version = 11 : i64} {
  func.func @_mm_kernel(%arg0: i32, %arg1: i32, %arg2: memref<512x147xbf16, #tpu.memory_space<vmem>>, %arg3: memref<147x64xbf16, #tpu.memory_space<vmem>>, %arg4: memref<1x64xf32, #tpu.memory_space<vmem>>, %arg5: memref<512x64xbf16, #tpu.memory_space<vmem>>) attributes {dimension_semantics = [#tpu.dimension_semantics<parallel>, #tpu.dimension_semantics<parallel>], iteration_bounds = array<i64: 4, 1>, scalar_prefetch = 0 : i64, scratch_operands = 0 : i64, tpu.core_type = #tpu.core_type<tc>, window_params = [{transform_indices = @transform_0, window_bounds = array<i64: 512, 147>}, {transform_indices = @transform_1, window_bounds = array<i64: 147, 64>}, {transform_indices = @transform_2, window_bounds = array<i64: 1, 64>}, {transform_indices = @transform_3, window_bounds = array<i64: 512, 64>}]} {
    %c0 = arith.constant 0 : index
    %c0_0 = arith.constant 0 : index
    %0 = vector.load %arg2[%c0, %c0_0] : memref<512x147xbf16, #tpu.memory_space<vmem>>, vector<512x147xbf16>
    %c0_1 = arith.constant 0 : index
    %c0_2 = arith.constant 0 : index
    %1 = vector.load %arg3[%c0_1, %c0_2] : memref<147x64xbf16, #tpu.memory_space<vmem>>, vector<147x64xbf16>
    %cst = arith.constant dense<0.000000e+00> : vector<512x64xf32>
    %2 = tpu.matmul %0, %1, %cst {dimension_numbers = #tpu.dot_dimension_numbers<[1], [0], [0], [1], [0, 0, 1, 1], [], []>} : vector<512x147xbf16>, vector<147x64xbf16>, vector<512x64xf32> -> vector<512x64xf32>
    %c0_3 = arith.constant 0 : index
    %c0_4 = arith.constant 0 : index
    %3 = vector.load %arg4[%c0_3, %c0_4] : memref<1x64xf32, #tpu.memory_space<vmem>>, vector<1x64xf32>
    %4 = vector.broadcast %3 : vector<1x64xf32> to vector<512x64xf32>
    %5 = arith.addf %2, %4 : vector<512x64xf32>
    %cst_5 = arith.constant 0.000000e+00 : f32
    %6 = vector.broadcast %cst_5 : f32 to vector<512x64xf32>
    %7 = arith.maximumf %5, %6 : vector<512x64xf32>
    %8 = arith.truncf %7 : vector<512x64xf32> to vector<512x64xbf16>
    %c0_6 = arith.constant 0 : index
    %c0_7 = arith.constant 0 : index
    %9 = vector.load %arg5[%c0_6, %c0_7] : memref<512x64xbf16, #tpu.memory_space<vmem>>, vector<512x64xbf16>
    tpu.vector_store %arg5[%c0_6, %c0_7], %8 {strides = array<i32>} : memref<512x64xbf16, #tpu.memory_space<vmem>>, vector<512x64xbf16>,
    return
  }
  func.func @transform_0(%arg0: i32, %arg1: i32) -> (i32, i32) {
    %c0_i32 = arith.constant 0 : i32
    %c0_i32_0 = arith.constant 0 : i32
    return %arg0, %c0_i32 : i32, i32
  }
  func.func @transform_1(%arg0: i32, %arg1: i32) -> (i32, i32) {
    %c0_i32 = arith.constant 0 : i32
    %c0_i32_0 = arith.constant 0 : i32
    return %c0_i32, %arg1 : i32, i32
  }
  func.func @transform_2(%arg0: i32, %arg1: i32) -> (i32, i32) {
    %c0_i32 = arith.constant 0 : i32
    %c0_i32_0 = arith.constant 0 : i32
    return %c0_i32, %arg1 : i32, i32
  }
  func.func @transform_3(%arg0: i32, %arg1: i32) -> (i32, i32) {
    %c0_i32 = arith.constant 0 : i32
    return %arg0, %arg1 : i32, i32
  }
}

</mosaic_0001>

<bundles_post_ra>
// kernel: tpu_custom_call.1
= control target key start
LH: loop header
LB: loop body
LE: loop exit
PB: predicated region body
PF: predicated region fallthrough
CT: control target
= control target key end

     0   :  { %s1992_s12 = smov 0   ;;  %s1994_s13 = smov 0   ;;  %s2356_s0 = inlined_call_operand.vmem [shape: bf16[2048,147], index: 0, kind: input, shape index: {}]   ;;  %s2357_s1 = inlined_call_operand.vmem [shape: bf16[147,64], index: 1, kind: input, shape index: {}]   ;;  %s2358_s2 = inlined_call_operand.vmem [shape: f32[1,64], index: 2, kind: input, shape index: {}]   ;;  %s2359_s3 = inlined_call_operand.vmem [shape: bf16[2048,64], index: 3, kind: output, shape index: {}]  }
   0x1   :  { %s1996_s14 = smov 0  }
   0x2 LB: > { %s25_s15 = sadd.s32 1, %s1964_s13  ;;  %p1550_p0 = scmp.ge.s32.totalorder %s1968_s14, 1  ;;  %s1968_s14 = sphi %s1996_s14, %s13_s14   ;;  %s1964_s13 = sphi %s1994_s13, %s2361_s13   ;;  %s1960_s12 = sphi %s1992_s12, %s2360_s12  }
   0x3   : > { %p27_p1 = scmp.ge.s32.totalorder %s25_s15, 4  ;;  %p170_p2 = scmp.lt.s32.totalorder %s1968_s14, 5 }
   0x5   : > { %s2363_s15 = smov (%p27_p1, %s25_s15), 0  ;;  %p171_p3 = pnand %p1550_p0, %p170_p2 }
   0x6   : > { %s1551_s22 = sshll.u32 (!%p171_p3), %s1960_s12, 6 }
   0x7   : > { %174 = sbr.rel (%p171_p3) target bundleno = 377 (0x179), region = 32  ;;  %p206_p4 = scmp.lt.s32.totalorder (!%p171_p3), %s1551_s22, 255 }
   0xc   : > { %v1840_v0 = vld [vmem:[%s2357_s1 + $0x38] sm:$0xff]   ;;  %v1970_v1 = vmov 0   ;;  %v1841_v2 = vld [vmem:[%s2357_s1 + $0x30] sm:$0xff]   ;;  %v1842_v3 = vld [vmem:[%s2357_s1 + $0x28] sm:$0xff]   ;;  %s2365_s22 = smov (!%p206_p4, %s1551_s22), 255  ;;  %vm664_vm0 = vcmask 154624  }
   0xd   : > { %768 = vmatprep.subr.bf16.mxu0 %v1970_v1  ;;  %1794 = vmatprep.subr.bf16.mxu1 %v1970_v1  ;;  %v1843_v4 = vld [vmem:[%s2357_s1 + $0x20] sm:$0xff]   ;;  %s1729_s25 = sshll.u32 %s2365_s22, 3  ;;  %v1844_v5 = vld [vmem:[%s2357_s1 + $0x18] sm:$0xff]   ;;  %v1845_v8 = vld [vmem:[%s2357_s1 + $0x10] sm:$0xff]   ;;  %vm761_vm1 = vcmask 1040384   ;;  %vm762_vm2 = vcmask 1041408  }
   0xe   : > { %769 = vmatpush1.bf16.msra.mxu0 %v1840_v0  ;;  %1804 = vmatpush1.bf16.msra.mxu1 %v1840_v0  ;;  %s2028_s28 = scalar_lea.vmem %s2356_s0, %s1729_s25  ;;  %v1846_v9 = vld [vmem:[%s2357_s1 + $0x8] sm:$0xff]   ;;  %v1971_v10 = vmov 65535   ;;  %v1847_v12 = vld [vmem:[%s2357_s1] sm:$0xff]   ;;  %s1555_s19 = sshll.u32 %s2365_s22, 2  ;;  %vm1377_vm3 = vcmask 519168  }
   0xf   : > { %770 = vmatprep.subr.bf16.mxu0 %v1970_v1  ;;  %1795 = vmatprep.subr.bf16.mxu1 %v1970_v1  ;;  %v1852_v6 = vld [vmem:[%s2028_s28 + $0x4] ss:$8 sps:$4 sm:$0xff]   ;;  %v763_v11 = vsel %vm761_vm1, 4294967295, %v1971_v10  ;;  %v1848_v13 = vld [vmem:[%s2357_s1 + $0x48] ss:$0 sps:$4 sm:$0x33]   ;;  %s2155_s23 = scalar_lea.vmem %s2359_s3, %s1555_s19 }
  0x10   : > { %v1855_v7 = vld [vmem:[%s2028_s28 + $0x104] ss:$8 sps:$4 sm:$0xff]   ;;  %1631 = vmatprep.mubr.msk.bf16.mxu0 %vm664_vm0, %v1852_v6  ;;  %v764_v14 = vsel %vm762_vm2, %v763_v11, 0  ;;  %v1850_v17 = vld [vmem:[%s2028_s28] ss:$8 sps:$4 sm:$0xff]  }
  0x11   : > { %1647 = vmatprep.mubr.msk.bf16.mxu1 %vm664_vm0, %v1855_v7  ;;  %v766_v15 = vand.u32 %v1848_v13, %v764_v14  ;;  %v1849_v16 = vld [vmem:[%s2357_s1 + $0x40] sm:$0xff]   ;;  %v1856_v19 = vld [vmem:[%s2028_s28 + $0x14] ss:$8 sps:$4 sm:$0xff]   ;;  %v1860_v21 = vld [vmem:[%s2028_s28 + $0x10] ss:$8 sps:$4 sm:$0xff]  }
  0x12   : > { %771 = vmatpush1.bf16.msra.mxu0 %v1841_v2  ;;  %1805 = vmatpush1.bf16.msra.mxu1 %v1841_v2  ;;  %v1853_v18 = vld [vmem:[%s2028_s28 + $0x100] ss:$8 sps:$4 sm:$0xff]   ;;  %v1858_v20 = vld [vmem:[%s2028_s28 + $0x114] ss:$8 sps:$4 sm:$0xff]   ;;  %v1861_v22 = vld [vmem:[%s2028_s28 + $0x110] ss:$8 sps:$4 sm:$0xff]  }
  0x13   : > { %772 = vmatprep.subr.bf16.mxu0 %v1970_v1  ;;  %1796 = vmatprep.subr.bf16.mxu1 %v1970_v1  ;;  %v1862_v23 = vld [vmem:[%s2028_s28 + $0x24] ss:$8 sps:$4 sm:$0xff]   ;;  %v1866_v25 = vld [vmem:[%s2028_s28 + $0x20] ss:$8 sps:$4 sm:$0xff]   ;;  %v1868_v27 = vld [vmem:[%s2028_s28 + $0x34] ss:$8 sps:$4 sm:$0xff]  }
  0x14   : > { %v1864_v24 = vld [vmem:[%s2028_s28 + $0x124] ss:$8 sps:$4 sm:$0xff]   ;;  %v1867_v26 = vld [vmem:[%s2028_s28 + $0x120] ss:$8 sps:$4 sm:$0xff]   ;;  %v1870_v28 = vld [vmem:[%s2028_s28 + $0x134] ss:$8 sps:$4 sm:$0xff]  }
  0x15   : > { %v1872_v29 = vld [vmem:[%s2028_s28 + $0x30] ss:$8 sps:$4 sm:$0xff]   ;;  %v1874_v31 = vld [vmem:[%s2028_s28 + $0x44] ss:$8 sps:$4 sm:$0xff]   ;;  %v1878_v33 = vld [vmem:[%s2028_s28 + $0x40] ss:$8 sps:$4 sm:$0xff]  }
  0x16   : > { %773 = vmatpush1.bf16.msra.mxu0 %v1842_v3  ;;  %1806 = vmatpush1.bf16.msra.mxu1 %v1842_v3  ;;  %v1873_v30 = vld [vmem:[%s2028_s28 + $0x130] ss:$8 sps:$4 sm:$0xff]   ;;  %v1876_v32 = vld [vmem:[%s2028_s28 + $0x144] ss:$8 sps:$4 sm:$0xff]   ;;  %v1879_v34 = vld [vmem:[%s2028_s28 + $0x140] ss:$8 sps:$4 sm:$0xff]  }
  0x17   : > { %774 = vmatprep.subr.bf16.mxu0 %v1970_v1  ;;  %1797 = vmatprep.subr.bf16.mxu1 %v1970_v1  ;;  %v1880_v35 = vld [vmem:[%s2028_s28 + $0x54] ss:$8 sps:$4 sm:$0xff]   ;;  %v1884_v37 = vld [vmem:[%s2028_s28 + $0x50] ss:$8 sps:$4 sm:$0xff]   ;;  %v1886_v39 = vld [vmem:[%s2028_s28 + $0x64] ss:$8 sps:$4 sm:$0xff]  }
  0x18   : > { %v1882_v36 = vld [vmem:[%s2028_s28 + $0x154] ss:$8 sps:$4 sm:$0xff]   ;;  %v1885_v38 = vld [vmem:[%s2028_s28 + $0x150] ss:$8 sps:$4 sm:$0xff]   ;;  %v1888_v40 = vld [vmem:[%s2028_s28 + $0x164] ss:$8 sps:$4 sm:$0xff]  }
  0x19   : > { %v1890_v41 = vld [vmem:[%s2028_s28 + $0x60] ss:$8 sps:$4 sm:$0xff]   ;;  %v1892_v43 = vld [vmem:[%s2028_s28 + $0x74] ss:$8 sps:$4 sm:$0xff]   ;;  %v1896_v45 = vld [vmem:[%s2028_s28 + $0x70] ss:$8 sps:$4 sm:$0xff]  }
  0x1a   : > { %775 = vmatpush1.bf16.msra.mxu0 %v1843_v4  ;;  %1807 = vmatpush1.bf16.msra.mxu1 %v1843_v4  ;;  %v1891_v42 = vld [vmem:[%s2028_s28 + $0x160] ss:$8 sps:$4 sm:$0xff]   ;;  %v1894_v44 = vld [vmem:[%s2028_s28 + $0x174] ss:$8 sps:$4 sm:$0xff]   ;;  %v1897_v46 = vld [vmem:[%s2028_s28 + $0x170] ss:$8 sps:$4 sm:$0xff]  }
  0x1b   : > { %776 = vmatprep.subr.bf16.mxu0 %v1970_v1  ;;  %1798 = vmatprep.subr.bf16.mxu1 %v1970_v1  ;;  %v1898_v47 = vld [vmem:[%s2028_s28 + $0x84] ss:$8 sps:$4 sm:$0xff]   ;;  %v1902_v49 = vld [vmem:[%s2028_s28 + $0x80] ss:$8 sps:$4 sm:$0xff]   ;;  %v1904_v51 = vld [vmem:[%s2028_s28 + $0x94] ss:$8 sps:$4 sm:$0xff]  }
  0x1c   : > { %v1900_v48 = vld [vmem:[%s2028_s28 + $0x184] ss:$8 sps:$4 sm:$0xff]   ;;  %v1903_v50 = vld [vmem:[%s2028_s28 + $0x180] ss:$8 sps:$4 sm:$0xff]   ;;  %v1906_v52 = vld [vmem:[%s2028_s28 + $0x194] ss:$8 sps:$4 sm:$0xff]  }
  0x1d   : > { %v1908_v53 = vld [vmem:[%s2028_s28 + $0x90] ss:$8 sps:$4 sm:$0xff]   ;;  %v1910_v55 = vld [vmem:[%s2028_s28 + $0xa4] ss:$8 sps:$4 sm:$0xff]   ;;  %v1914_v57 = vld [vmem:[%s2028_s28 + $0xa0] ss:$8 sps:$4 sm:$0xff]  }
  0x1e   : > { %777 = vmatpush1.bf16.msra.mxu0 %v1844_v5  ;;  %1808 = vmatpush1.bf16.msra.mxu1 %v1844_v5  ;;  %v1909_v54 = vld [vmem:[%s2028_s28 + $0x190] ss:$8 sps:$4 sm:$0xff]   ;;  %v1912_v56 = vld [vmem:[%s2028_s28 + $0x1a4] ss:$8 sps:$4 sm:$0xff]   ;;  %v1915_v58 = vld [vmem:[%s2028_s28 + $0x1a0] ss:$8 sps:$4 sm:$0xff]  }
  0x1f   : > { %778 = vmatprep.subr.bf16.mxu0 %v1970_v1  ;;  %1799 = vmatprep.subr.bf16.mxu1 %v1970_v1  ;;  %v1916_v59 = vld [vmem:[%s2028_s28 + $0xb4] ss:$8 sps:$4 sm:$0xff]   ;;  %v1920_v61 = vld [vmem:[%s2028_s28 + $0xb0] ss:$8 sps:$4 sm:$0xff]   ;;  %v1922_v63 = vld [vmem:[%s2028_s28 + $0xc4] ss:$8 sps:$4 sm:$0xff]  }
  0x20   : > { %v1918_v60 = vld [vmem:[%s2028_s28 + $0x1b4] ss:$8 sps:$4 sm:$0xff]   ;;  %v1921_v62 = vld [vmem:[%s2028_s28 + $0x1b0] ss:$8 sps:$4 sm:$0xff]   ;;  %v1924_v0 = vld [vmem:[%s2028_s28 + $0x1c4] ss:$8 sps:$4 sm:$0xff]  }
  0x21   : > { %v1927_v2 = vld [vmem:[%s2028_s28 + $0x1c0] ss:$8 sps:$4 sm:$0xff]   ;;  %v1928_v3 = vld [vmem:[%s2028_s28 + $0xd4] ss:$8 sps:$4 sm:$0xff]   ;;  %v1932_v5 = vld [vmem:[%s2028_s28 + $0xd0] ss:$8 sps:$4 sm:$0xff]  }
  0x22   : > { %779 = vmatpush1.bf16.msra.mxu0 %v1845_v8  ;;  %1809 = vmatpush1.bf16.msra.mxu1 %v1845_v8  ;;  %v1930_v4 = vld [vmem:[%s2028_s28 + $0x1d4] ss:$8 sps:$4 sm:$0xff]   ;;  %v1933_v6 = vld [vmem:[%s2028_s28 + $0x1d0] ss:$8 sps:$4 sm:$0xff]   ;;  %v1934_v7 = vld [vmem:[%s2028_s28 + $0xe4] ss:$8 sps:$4 sm:$0xff]  }
  0x23   : > { %780 = vmatprep.subr.bf16.mxu0 %v1970_v1  ;;  %1800 = vmatprep.subr.bf16.mxu1 %v1970_v1  ;;  %v1936_v8 = vld [vmem:[%s2028_s28 + $0x1e4] ss:$8 sps:$4 sm:$0xff]   ;;  %v1939_v10 = vld [vmem:[%s2028_s28 + $0x1e0] ss:$8 sps:$4 sm:$0xff]   ;;  %v1940_v11 = vld [vmem:[%s2028_s28 + $0xf4] ss:$8 sps:$4 sm:$0xff]  }
  0x24   : > { %v1944_v13 = vld [vmem:[%s2028_s28 + $0xf0] ss:$8 sps:$4 sm:$0xff]  }
  0x25   : > { %v1945_v14 = vld [vmem:[%s2028_s28 + $0x1f0] ss:$8 sps:$4 sm:$0xff]  }
  0x26   : > { %781 = vmatpush1.bf16.msra.mxu0 %v1846_v9  ;;  %1810 = vmatpush1.bf16.msra.mxu1 %v1846_v9  ;;  %v1938_v9 = vld [vmem:[%s2028_s28 + $0xe0] ss:$8 sps:$4 sm:$0xff]  }
  0x27   : > { %782 = vmatprep.subr.bf16.mxu0 %v1970_v1  ;;  %1801 = vmatprep.subr.bf16.mxu1 %v1970_v1 }
  0x2a   : > { %783 = vmatpush1.bf16.msra.mxu0 %v1847_v12  ;;  %1811 = vmatpush1.bf16.msra.mxu1 %v1847_v12  ;;  %v1942_v12 = vld [vmem:[%s2028_s28 + $0x1f4] ss:$8 sps:$4 sm:$0xff]  }
  0x2b   : > { %796 = vmatprep.subr.bf16.mxu0 %v1970_v1  ;;  %1802 = vmatprep.subr.bf16.mxu1 %v1970_v1 }
  0x2e   : > { %797 = vmatpush2.bf16.msra.mxu0 %v766_v15  ;;  %1812 = vmatpush2.bf16.msra.mxu1 %v766_v15  ;;  %v2147_v15 = vld [vmem:[%s2358_s2] ss:$0 sm:$0xff] }
  0x2f   : > { %798 = vmatprep.subr.bf16.mxu0 %v1970_v1  ;;  %1803 = vmatprep.subr.bf16.mxu1 %v1970_v1  ;;  %v1926_v1 = vld [vmem:[%s2028_s28 + $0xc0] ss:$8 sps:$4 sm:$0xff]  }
  0x32   : > { %799 = vmatpush2.bf16.msra.mxu0 %v1849_v16  ;;  %1813 = vmatpush2.bf16.msra.mxu1 %v1849_v16 }
  0x35   : > { %801 = vmatmul.mubr.bf16.vlgmr.msra.gmra.mxu0 %v1850_v17  ;;  %929 = vmatmul.mubr.bf16.vlgmr.msra.gmra.mxu1 %v1853_v18 }
  0x36   : > { %1632 = vmatprep.mubr.msk.bf16.mxu0 %vm664_vm0, %v1856_v19  ;;  %1648 = vmatprep.mubr.msk.bf16.mxu1 %vm664_vm0, %v1858_v20 }
  0x3d   : > { %809 = vmatmul.mubr.bf16.gmra.mxu0 %v1860_v21  ;;  %937 = vmatmul.mubr.bf16.gmra.mxu1 %v1861_v22 }
  0x3e   : > { %1633 = vmatprep.mubr.msk.bf16.mxu0 %vm664_vm0, %v1862_v23  ;;  %1649 = vmatprep.mubr.msk.bf16.mxu1 %vm664_vm0, %v1864_v24 }
  0x45   : > { %817 = vmatmul.mubr.bf16.gmra.mxu0 %v1866_v25  ;;  %945 = vmatmul.mubr.bf16.gmra.mxu1 %v1867_v26 }
  0x46   : > { %1634 = vmatprep.mubr.msk.bf16.mxu0 %vm664_vm0, %v1868_v27  ;;  %1650 = vmatprep.mubr.msk.bf16.mxu1 %vm664_vm0, %v1870_v28 }
  0x4d   : > { %825 = vmatmul.mubr.bf16.gmra.mxu0 %v1872_v29  ;;  %953 = vmatmul.mubr.bf16.gmra.mxu1 %v1873_v30 }
  0x4e   : > { %1635 = vmatprep.mubr.msk.bf16.mxu0 %vm664_vm0, %v1874_v31  ;;  %1651 = vmatprep.mubr.msk.bf16.mxu1 %vm664_vm0, %v1876_v32 }
  0x55   : > { %833 = vmatmul.mubr.bf16.gmra.mxu0 %v1878_v33  ;;  %961 = vmatmul.mubr.bf16.gmra.mxu1 %v1879_v34 }
  0x56   : > { %1636 = vmatprep.mubr.msk.bf16.mxu0 %vm664_vm0, %v1880_v35  ;;  %1652 = vmatprep.mubr.msk.bf16.mxu1 %vm664_vm0, %v1882_v36 }
  0x5d   : > { %841 = vmatmul.mubr.bf16.gmra.mxu0 %v1884_v37  ;;  %969 = vmatmul.mubr.bf16.gmra.mxu1 %v1885_v38 }
  0x5e   : > { %1637 = vmatprep.mubr.msk.bf16.mxu0 %vm664_vm0, %v1886_v39  ;;  %1653 = vmatprep.mubr.msk.bf16.mxu1 %vm664_vm0, %v1888_v40 }
  0x65   : > { %849 = vmatmul.mubr.bf16.gmra.mxu0 %v1890_v41  ;;  %977 = vmatmul.mubr.bf16.gmra.mxu1 %v1891_v42 }
  0x66   : > { %1638 = vmatprep.mubr.msk.bf16.mxu0 %vm664_vm0, %v1892_v43  ;;  %1654 = vmatprep.mubr.msk.bf16.mxu1 %vm664_vm0, %v1894_v44 }
  0x6d   : > { %857 = vmatmul.mubr.bf16.gmra.mxu0 %v1896_v45  ;;  %985 = vmatmul.mubr.bf16.gmra.mxu1 %v1897_v46 }
  0x6e   : > { %1639 = vmatprep.mubr.msk.bf16.mxu0 %vm664_vm0, %v1898_v47  ;;  %1655 = vmatprep.mubr.msk.bf16.mxu1 %vm664_vm0, %v1900_v48 }
  0x75   : > { %865 = vmatmul.mubr.bf16.gmra.mxu0 %v1902_v49  ;;  %993 = vmatmul.mubr.bf16.gmra.mxu1 %v1903_v50 }
  0x76   : > { %1640 = vmatprep.mubr.msk.bf16.mxu0 %vm664_vm0, %v1904_v51  ;;  %1656 = vmatprep.mubr.msk.bf16.mxu1 %vm664_vm0, %v1906_v52 }
  0x7d   : > { %873 = vmatmul.mubr.bf16.gmra.mxu0 %v1908_v53  ;;  %1001 = vmatmul.mubr.bf16.gmra.mxu1 %v1909_v54 }
  0x7e   : > { %1641 = vmatprep.mubr.msk.bf16.mxu0 %vm664_vm0, %v1910_v55  ;;  %1657 = vmatprep.mubr.msk.bf16.mxu1 %vm664_vm0, %v1912_v56 }
  0x85   : > { %881 = vmatmul.mubr.bf16.gmra.mxu0 %v1914_v57  ;;  %1009 = vmatmul.mubr.bf16.gmra.mxu1 %v1915_v58 }
  0x86   : > { %1642 = vmatprep.mubr.msk.bf16.mxu0 %vm664_vm0, %v1916_v59  ;;  %1658 = vmatprep.mubr.msk.bf16.mxu1 %vm664_vm0, %v1918_v60 }
  0x8d   : > { %889 = vmatmul.mubr.bf16.gmra.mxu0 %v1920_v61  ;;  %1017 = vmatmul.mubr.bf16.gmra.mxu1 %v1921_v62 }
  0x8e   : > { %1643 = vmatprep.mubr.msk.bf16.mxu0 %vm664_vm0, %v1922_v63  ;;  %1659 = vmatprep.mubr.msk.bf16.mxu1 %vm664_vm0, %v1924_v0 }
  0x95   : > { %897 = vmatmul.mubr.bf16.gmra.mxu0 %v1926_v1  ;;  %1025 = vmatmul.mubr.bf16.gmra.mxu1 %v1927_v2 }
  0x96   : > { %1644 = vmatprep.mubr.msk.bf16.mxu0 %vm664_vm0, %v1928_v3  ;;  %1660 = vmatprep.mubr.msk.bf16.mxu1 %vm664_vm0, %v1930_v4 }
  0x9d   : > { %905 = vmatmul.mubr.bf16.gmra.mxu0 %v1932_v5  ;;  %1033 = vmatmul.mubr.bf16.gmra.mxu1 %v1933_v6 }
  0x9e   : > { %1645 = vmatprep.mubr.msk.bf16.mxu0 %vm664_vm0, %v1934_v7  ;;  %1661 = vmatprep.mubr.msk.bf16.mxu1 %vm664_vm0, %v1936_v8 }
  0xa5   : > { %913 = vmatmul.mubr.bf16.gmra.mxu0 %v1938_v9  ;;  %1041 = vmatmul.mubr.bf16.gmra.mxu1 %v1939_v10 }
  0xa6   : > { %1646 = vmatprep.mubr.msk.bf16.mxu0 %vm664_vm0, %v1940_v11  ;;  %1662 = vmatprep.mubr.msk.bf16.mxu1 %vm664_vm0, %v1942_v12 }
  0xad   : > { %921 = vmatmul.mubr.bf16.gmra.mxu0 %v1944_v13  ;;  %1049 = vmatmul.mubr.bf16.gmra.mxu1 %v1945_v14 }
  0xf5   : > { %v802_v16 = vpop.f32.mrf.mxu0  ;;  %v930_v17 = vpop.f32.mrf.mxu1 }
  0xf6   : > { %v803_v18 = vadd.f32 %v2147_v15, %v802_v16  ;;  %v931_v19 = vadd.f32 %v2147_v15, %v930_v17 }
  0xf7   : > { %v804_v20 = vpop.f32.mrf.mxu0  ;;  %v932_v21 = vpop.f32.mrf.mxu1 }
  0xf8   : > { %v1057_v22 = vmax.f32 %v803_v18, 0.0  ;;  %v1089_v23 = vmax.f32 %v931_v19, 0.0 }
  0xf9   : > { %v805_v24 = vpop.f32.mrf.mxu0  ;;  %v933_v25 = vpop.f32.mrf.mxu1 }
  0xfa   : > { %v1730_v26 = vpack.c.bf16 %v1057_v22, %v1057_v22  ;;  %v1762_v27 = vpack.c.bf16 %v1089_v23, %v1089_v23  ;;  %v806_v28 = vadd.f32 %v2147_v15, %v805_v24  ;;  %v934_v29 = vadd.f32 %v2147_v15, %v933_v25 }
  0xfb   : > { %v807_v30 = vpop.f32.mrf.mxu0  ;;  %v935_v31 = vpop.f32.mrf.mxu1 }
  0xfc   : > { %1378 = vst.msk [vmem:[%s2155_s23] sm:$0xf] %vm1377_vm3, %v1730_v26  ;;  %1410 = vst.msk [vmem:[%s2155_s23 + $0x80] sm:$0xf] %vm1377_vm3, %v1762_v27  ;;  %v1058_v32 = vmax.f32 %v806_v28, 0.0  ;;  %v1090_v33 = vmax.f32 %v934_v29, 0.0 }
  0xfd   : > { %v810_v34 = vpop.f32.mrf.mxu0  ;;  %v938_v35 = vpop.f32.mrf.mxu1 }
  0xfe   : > { %v1731_v36 = vpack.c.bf16 %v1058_v32, %v1058_v32  ;;  %v1763_v37 = vpack.c.bf16 %v1090_v33, %v1090_v33  ;;  %v811_v38 = vadd.f32 %v2147_v15, %v810_v34  ;;  %v939_v39 = vadd.f32 %v2147_v15, %v938_v35 }
  0xff   : > { %v812_v40 = vpop.f32.mrf.mxu0  ;;  %v940_v41 = vpop.f32.mrf.mxu1 }
 0x100   : > { %1379 = vst.msk [vmem:[%s2155_s23 + $0x4] sm:$0xf] %vm1377_vm3, %v1731_v36  ;;  %1411 = vst.msk [vmem:[%s2155_s23 + $0x84] sm:$0xf] %vm1377_vm3, %v1763_v37  ;;  %v1059_v42 = vmax.f32 %v811_v38, 0.0  ;;  %v1091_v43 = vmax.f32 %v939_v39, 0.0 }
 0x101   : > { %v813_v44 = vpop.f32.mrf.mxu0  ;;  %v941_v45 = vpop.f32.mrf.mxu1 }
 0x102   : > { %v1732_v46 = vpack.c.bf16 %v1059_v42, %v1059_v42  ;;  %v1764_v47 = vpack.c.bf16 %v1091_v43, %v1091_v43  ;;  %v814_v48 = vadd.f32 %v2147_v15, %v813_v44  ;;  %v942_v49 = vadd.f32 %v2147_v15, %v941_v45 }
 0x103   : > { %v815_v50 = vpop.f32.mrf.mxu0  ;;  %v943_v51 = vpop.f32.mrf.mxu1 }
 0x104   : > { %1380 = vst.msk [vmem:[%s2155_s23 + $0x8] sm:$0xf] %vm1377_vm3, %v1732_v46  ;;  %1412 = vst.msk [vmem:[%s2155_s23 + $0x88] sm:$0xf] %vm1377_vm3, %v1764_v47  ;;  %v1060_v52 = vmax.f32 %v814_v48, 0.0  ;;  %v1092_v53 = vmax.f32 %v942_v49, 0.0 }
 0x105   : > { %v818_v54 = vpop.f32.mrf.mxu0  ;;  %v946_v55 = vpop.f32.mrf.mxu1 }
 0x106   : > { %v1733_v56 = vpack.c.bf16 %v1060_v52, %v1060_v52  ;;  %v1765_v57 = vpack.c.bf16 %v1092_v53, %v1092_v53  ;;  %v819_v58 = vadd.f32 %v2147_v15, %v818_v54  ;;  %v947_v59 = vadd.f32 %v2147_v15, %v946_v55 }
 0x107   : > { %v820_v60 = vpop.f32.mrf.mxu0  ;;  %v948_v61 = vpop.f32.mrf.mxu1 }
 0x108   : > { %1381 = vst.msk [vmem:[%s2155_s23 + $0xc] sm:$0xf] %vm1377_vm3, %v1733_v56  ;;  %1413 = vst.msk [vmem:[%s2155_s23 + $0x8c] sm:$0xf] %vm1377_vm3, %v1765_v57  ;;  %v1061_v62 = vmax.f32 %v819_v58, 0.0  ;;  %v1093_v63 = vmax.f32 %v947_v59, 0.0 }
 0x109   : > { %v821_v0 = vpop.f32.mrf.mxu0  ;;  %v949_v1 = vpop.f32.mrf.mxu1 }
 0x10a   : > { %v1734_v2 = vpack.c.bf16 %v1061_v62, %v1061_v62  ;;  %v1766_v3 = vpack.c.bf16 %v1093_v63, %v1093_v63  ;;  %v822_v4 = vadd.f32 %v2147_v15, %v821_v0  ;;  %v950_v5 = vadd.f32 %v2147_v15, %v949_v1 }
 0x10b   : > { %v823_v6 = vpop.f32.mrf.mxu0  ;;  %v951_v7 = vpop.f32.mrf.mxu1 }
 0x10c   : > { %1382 = vst.msk [vmem:[%s2155_s23 + $0x10] sm:$0xf] %vm1377_vm3, %v1734_v2  ;;  %1414 = vst.msk [vmem:[%s2155_s23 + $0x90] sm:$0xf] %vm1377_vm3, %v1766_v3  ;;  %v1062_v8 = vmax.f32 %v822_v4, 0.0  ;;  %v1094_v9 = vmax.f32 %v950_v5, 0.0 }
 0x10d   : > { %v826_v10 = vpop.f32.mrf.mxu0  ;;  %v954_v11 = vpop.f32.mrf.mxu1 }
 0x10e   : > { %v1735_v12 = vpack.c.bf16 %v1062_v8, %v1062_v8  ;;  %v1767_v13 = vpack.c.bf16 %v1094_v9, %v1094_v9  ;;  %v827_v14 = vadd.f32 %v2147_v15, %v826_v10  ;;  %v955_v16 = vadd.f32 %v2147_v15, %v954_v11 }
 0x10f   : > { %v828_v17 = vpop.f32.mrf.mxu0  ;;  %v956_v18 = vpop.f32.mrf.mxu1 }
 0x110   : > { %1383 = vst.msk [vmem:[%s2155_s23 + $0x14] sm:$0xf] %vm1377_vm3, %v1735_v12  ;;  %1415 = vst.msk [vmem:[%s2155_s23 + $0x94] sm:$0xf] %vm1377_vm3, %v1767_v13  ;;  %v1063_v19 = vmax.f32 %v827_v14, 0.0  ;;  %v1095_v20 = vmax.f32 %v955_v16, 0.0 }
 0x111   : > { %v829_v21 = vpop.f32.mrf.mxu0  ;;  %v957_v22 = vpop.f32.mrf.mxu1 }
 0x112   : > { %v1736_v23 = vpack.c.bf16 %v1063_v19, %v1063_v19  ;;  %v1768_v24 = vpack.c.bf16 %v1095_v20, %v1095_v20  ;;  %v830_v25 = vadd.f32 %v2147_v15, %v829_v21  ;;  %v958_v26 = vadd.f32 %v2147_v15, %v957_v22 }
 0x113   : > { %v831_v27 = vpop.f32.mrf.mxu0  ;;  %v959_v28 = vpop.f32.mrf.mxu1 }
 0x114   : > { %1384 = vst.msk [vmem:[%s2155_s23 + $0x18] sm:$0xf] %vm1377_vm3, %v1736_v23  ;;  %1416 = vst.msk [vmem:[%s2155_s23 + $0x98] sm:$0xf] %vm1377_vm3, %v1768_v24  ;;  %v1064_v29 = vmax.f32 %v830_v25, 0.0  ;;  %v1096_v30 = vmax.f32 %v958_v26, 0.0 }
 0x115   : > { %v834_v31 = vpop.f32.mrf.mxu0  ;;  %v962_v32 = vpop.f32.mrf.mxu1 }
 0x116   : > { %v1737_v33 = vpack.c.bf16 %v1064_v29, %v1064_v29  ;;  %v1769_v34 = vpack.c.bf16 %v1096_v30, %v1096_v30  ;;  %v835_v35 = vadd.f32 %v2147_v15, %v834_v31  ;;  %v963_v36 = vadd.f32 %v2147_v15, %v962_v32 }
 0x117   : > { %v836_v37 = vpop.f32.mrf.mxu0  ;;  %v964_v38 = vpop.f32.mrf.mxu1 }
 0x118   : > { %1385 = vst.msk [vmem:[%s2155_s23 + $0x1c] sm:$0xf] %vm1377_vm3, %v1737_v33  ;;  %1417 = vst.msk [vmem:[%s2155_s23 + $0x9c] sm:$0xf] %vm1377_vm3, %v1769_v34  ;;  %v1065_v39 = vmax.f32 %v835_v35, 0.0  ;;  %v1097_v40 = vmax.f32 %v963_v36, 0.0 }
 0x119   : > { %v837_v41 = vpop.f32.mrf.mxu0  ;;  %v965_v42 = vpop.f32.mrf.mxu1 }
 0x11a   : > { %v1738_v43 = vpack.c.bf16 %v1065_v39, %v1065_v39  ;;  %v1770_v44 = vpack.c.bf16 %v1097_v40, %v1097_v40  ;;  %v838_v45 = vadd.f32 %v2147_v15, %v837_v41  ;;  %v966_v46 = vadd.f32 %v2147_v15, %v965_v42 }
 0x11b   : > { %v839_v47 = vpop.f32.mrf.mxu0  ;;  %v967_v48 = vpop.f32.mrf.mxu1 }
 0x11c   : > { %1386 = vst.msk [vmem:[%s2155_s23 + $0x20] sm:$0xf] %vm1377_vm3, %v1738_v43  ;;  %1418 = vst.msk [vmem:[%s2155_s23 + $0xa0] sm:$0xf] %vm1377_vm3, %v1770_v44  ;;  %v1066_v49 = vmax.f32 %v838_v45, 0.0  ;;  %v1098_v50 = vmax.f32 %v966_v46, 0.0 }
 0x11d   : > { %v842_v51 = vpop.f32.mrf.mxu0  ;;  %v970_v52 = vpop.f32.mrf.mxu1 }
 0x11e   : > { %v1739_v53 = vpack.c.bf16 %v1066_v49, %v1066_v49  ;;  %v1771_v54 = vpack.c.bf16 %v1098_v50, %v1098_v50  ;;  %v843_v55 = vadd.f32 %v2147_v15, %v842_v51  ;;  %v971_v56 = vadd.f32 %v2147_v15, %v970_v52 }
 0x11f   : > { %v844_v57 = vpop.f32.mrf.mxu0  ;;  %v972_v58 = vpop.f32.mrf.mxu1 }
 0x120   : > { %1387 = vst.msk [vmem:[%s2155_s23 + $0x24] sm:$0xf] %vm1377_vm3, %v1739_v53  ;;  %1419 = vst.msk [vmem:[%s2155_s23 + $0xa4] sm:$0xf] %vm1377_vm3, %v1771_v54  ;;  %v1067_v59 = vmax.f32 %v843_v55, 0.0  ;;  %v1099_v60 = vmax.f32 %v971_v56, 0.0 }
 0x121   : > { %v845_v61 = vpop.f32.mrf.mxu0  ;;  %v973_v62 = vpop.f32.mrf.mxu1 }
 0x122   : > { %v1740_v63 = vpack.c.bf16 %v1067_v59, %v1067_v59  ;;  %v1772_v0 = vpack.c.bf16 %v1099_v60, %v1099_v60  ;;  %v846_v1 = vadd.f32 %v2147_v15, %v845_v61  ;;  %v974_v2 = vadd.f32 %v2147_v15, %v973_v62 }
 0x123   : > { %v847_v3 = vpop.f32.mrf.mxu0  ;;  %v975_v4 = vpop.f32.mrf.mxu1 }
 0x124   : > { %1388 = vst.msk [vmem:[%s2155_s23 + $0x28] sm:$0xf] %vm1377_vm3, %v1740_v63  ;;  %1420 = vst.msk [vmem:[%s2155_s23 + $0xa8] sm:$0xf] %vm1377_vm3, %v1772_v0  ;;  %v1068_v5 = vmax.f32 %v846_v1, 0.0  ;;  %v1100_v6 = vmax.f32 %v974_v2, 0.0 }
 0x125   : > { %v850_v7 = vpop.f32.mrf.mxu0  ;;  %v978_v8 = vpop.f32.mrf.mxu1 }
 0x126   : > { %v1741_v9 = vpack.c.bf16 %v1068_v5, %v1068_v5  ;;  %v1773_v10 = vpack.c.bf16 %v1100_v6, %v1100_v6  ;;  %v851_v11 = vadd.f32 %v2147_v15, %v850_v7  ;;  %v979_v12 = vadd.f32 %v2147_v15, %v978_v8 }
 0x127   : > { %v852_v13 = vpop.f32.mrf.mxu0  ;;  %v980_v14 = vpop.f32.mrf.mxu1 }
 0x128   : > { %1389 = vst.msk [vmem:[%s2155_s23 + $0x2c] sm:$0xf] %vm1377_vm3, %v1741_v9  ;;  %1421 = vst.msk [vmem:[%s2155_s23 + $0xac] sm:$0xf] %vm1377_vm3, %v1773_v10  ;;  %v1069_v16 = vmax.f32 %v851_v11, 0.0  ;;  %v1101_v17 = vmax.f32 %v979_v12, 0.0 }
 0x129   : > { %v853_v18 = vpop.f32.mrf.mxu0  ;;  %v981_v19 = vpop.f32.mrf.mxu1 }
 0x12a   : > { %v1742_v20 = vpack.c.bf16 %v1069_v16, %v1069_v16  ;;  %v1774_v21 = vpack.c.bf16 %v1101_v17, %v1101_v17  ;;  %v854_v22 = vadd.f32 %v2147_v15, %v853_v18  ;;  %v982_v23 = vadd.f32 %v2147_v15, %v981_v19 }
 0x12b   : > { %v855_v24 = vpop.f32.mrf.mxu0  ;;  %v983_v25 = vpop.f32.mrf.mxu1 }
 0x12c   : > { %1390 = vst.msk [vmem:[%s2155_s23 + $0x30] sm:$0xf] %vm1377_vm3, %v1742_v20  ;;  %1422 = vst.msk [vmem:[%s2155_s23 + $0xb0] sm:$0xf] %vm1377_vm3, %v1774_v21  ;;  %v1070_v26 = vmax.f32 %v854_v22, 0.0  ;;  %v1102_v27 = vmax.f32 %v982_v23, 0.0 }
 0x12d   : > { %v858_v28 = vpop.f32.mrf.mxu0  ;;  %v986_v29 = vpop.f32.mrf.mxu1 }
 0x12e   : > { %v1743_v30 = vpack.c.bf16 %v1070_v26, %v1070_v26  ;;  %v1775_v31 = vpack.c.bf16 %v1102_v27, %v1102_v27  ;;  %v859_v32 = vadd.f32 %v2147_v15, %v858_v28  ;;  %v987_v33 = vadd.f32 %v2147_v15, %v986_v29 }
 0x12f   : > { %v860_v34 = vpop.f32.mrf.mxu0  ;;  %v988_v35 = vpop.f32.mrf.mxu1 }
 0x130   : > { %1391 = vst.msk [vmem:[%s2155_s23 + $0x34] sm:$0xf] %vm1377_vm3, %v1743_v30  ;;  %1423 = vst.msk [vmem:[%s2155_s23 + $0xb4] sm:$0xf] %vm1377_vm3, %v1775_v31  ;;  %v1071_v36 = vmax.f32 %v859_v32, 0.0  ;;  %v1103_v37 = vmax.f32 %v987_v33, 0.0 }
 0x131   : > { %v861_v38 = vpop.f32.mrf.mxu0  ;;  %v989_v39 = vpop.f32.mrf.mxu1 }
 0x132   : > { %v1744_v40 = vpack.c.bf16 %v1071_v36, %v1071_v36  ;;  %v1776_v41 = vpack.c.bf16 %v1103_v37, %v1103_v37  ;;  %v862_v42 = vadd.f32 %v2147_v15, %v861_v38  ;;  %v990_v43 = vadd.f32 %v2147_v15, %v989_v39 }
 0x133   : > { %v863_v44 = vpop.f32.mrf.mxu0  ;;  %v991_v45 = vpop.f32.mrf.mxu1 }
 0x134   : > { %1392 = vst.msk [vmem:[%s2155_s23 + $0x38] sm:$0xf] %vm1377_vm3, %v1744_v40  ;;  %1424 = vst.msk [vmem:[%s2155_s23 + $0xb8] sm:$0xf] %vm1377_vm3, %v1776_v41  ;;  %v1072_v46 = vmax.f32 %v862_v42, 0.0  ;;  %v1104_v47 = vmax.f32 %v990_v43, 0.0 }
 0x135   : > { %v866_v48 = vpop.f32.mrf.mxu0  ;;  %v994_v49 = vpop.f32.mrf.mxu1 }
 0x136   : > { %v1745_v50 = vpack.c.bf16 %v1072_v46, %v1072_v46  ;;  %v1777_v51 = vpack.c.bf16 %v1104_v47, %v1104_v47  ;;  %v867_v52 = vadd.f32 %v2147_v15, %v866_v48  ;;  %v995_v53 = vadd.f32 %v2147_v15, %v994_v49 }
 0x137   : > { %v868_v54 = vpop.f32.mrf.mxu0  ;;  %v996_v55 = vpop.f32.mrf.mxu1 }
 0x138   : > { %1393 = vst.msk [vmem:[%s2155_s23 + $0x3c] sm:$0xf] %vm1377_vm3, %v1745_v50  ;;  %1425 = vst.msk [vmem:[%s2155_s23 + $0xbc] sm:$0xf] %vm1377_vm3, %v1777_v51  ;;  %v1073_v56 = vmax.f32 %v867_v52, 0.0  ;;  %v1105_v57 = vmax.f32 %v995_v53, 0.0 }
 0x139   : > { %v869_v58 = vpop.f32.mrf.mxu0  ;;  %v997_v59 = vpop.f32.mrf.mxu1 }
 0x13a   : > { %v1746_v60 = vpack.c.bf16 %v1073_v56, %v1073_v56  ;;  %v1778_v61 = vpack.c.bf16 %v1105_v57, %v1105_v57  ;;  %v870_v62 = vadd.f32 %v2147_v15, %v869_v58  ;;  %v998_v63 = vadd.f32 %v2147_v15, %v997_v59 }
 0x13b   : > { %v871_v0 = vpop.f32.mrf.mxu0  ;;  %v999_v1 = vpop.f32.mrf.mxu1 }
 0x13c   : > { %1394 = vst.msk [vmem:[%s2155_s23 + $0x40] sm:$0xf] %vm1377_vm3, %v1746_v60  ;;  %1426 = vst.msk [vmem:[%s2155_s23 + $0xc0] sm:$0xf] %vm1377_vm3, %v1778_v61  ;;  %v1074_v2 = vmax.f32 %v870_v62, 0.0  ;;  %v1106_v3 = vmax.f32 %v998_v63, 0.0 }
 0x13d   : > { %v874_v4 = vpop.f32.mrf.mxu0  ;;  %v1002_v5 = vpop.f32.mrf.mxu1 }
 0x13e   : > { %v1747_v6 = vpack.c.bf16 %v1074_v2, %v1074_v2  ;;  %v1779_v7 = vpack.c.bf16 %v1106_v3, %v1106_v3  ;;  %v875_v8 = vadd.f32 %v2147_v15, %v874_v4  ;;  %v1003_v9 = vadd.f32 %v2147_v15, %v1002_v5 }
 0x13f   : > { %v876_v10 = vpop.f32.mrf.mxu0  ;;  %v1004_v11 = vpop.f32.mrf.mxu1 }
 0x140   : > { %1395 = vst.msk [vmem:[%s2155_s23 + $0x44] sm:$0xf] %vm1377_vm3, %v1747_v6  ;;  %1427 = vst.msk [vmem:[%s2155_s23 + $0xc4] sm:$0xf] %vm1377_vm3, %v1779_v7  ;;  %v1075_v12 = vmax.f32 %v875_v8, 0.0  ;;  %v1107_v13 = vmax.f32 %v1003_v9, 0.0 }
 0x141   : > { %v877_v14 = vpop.f32.mrf.mxu0  ;;  %v1005_v16 = vpop.f32.mrf.mxu1 }
 0x142   : > { %v1748_v17 = vpack.c.bf16 %v1075_v12, %v1075_v12  ;;  %v1780_v18 = vpack.c.bf16 %v1107_v13, %v1107_v13  ;;  %v878_v19 = vadd.f32 %v2147_v15, %v877_v14  ;;  %v1006_v20 = vadd.f32 %v2147_v15, %v1005_v16 }
 0x143   : > { %v879_v21 = vpop.f32.mrf.mxu0  ;;  %v1007_v22 = vpop.f32.mrf.mxu1 }
 0x144   : > { %1396 = vst.msk [vmem:[%s2155_s23 + $0x48] sm:$0xf] %vm1377_vm3, %v1748_v17  ;;  %1428 = vst.msk [vmem:[%s2155_s23 + $0xc8] sm:$0xf] %vm1377_vm3, %v1780_v18  ;;  %v1076_v23 = vmax.f32 %v878_v19, 0.0  ;;  %v1108_v24 = vmax.f32 %v1006_v20, 0.0 }
 0x145   : > { %v882_v25 = vpop.f32.mrf.mxu0  ;;  %v1010_v26 = vpop.f32.mrf.mxu1 }
 0x146   : > { %v1749_v27 = vpack.c.bf16 %v1076_v23, %v1076_v23  ;;  %v1781_v28 = vpack.c.bf16 %v1108_v24, %v1108_v24  ;;  %v883_v29 = vadd.f32 %v2147_v15, %v882_v25  ;;  %v1011_v30 = vadd.f32 %v2147_v15, %v1010_v26 }
 0x147   : > { %v884_v31 = vpop.f32.mrf.mxu0  ;;  %v1012_v32 = vpop.f32.mrf.mxu1 }
 0x148   : > { %1397 = vst.msk [vmem:[%s2155_s23 + $0x4c] sm:$0xf] %vm1377_vm3, %v1749_v27  ;;  %1429 = vst.msk [vmem:[%s2155_s23 + $0xcc] sm:$0xf] %vm1377_vm3, %v1781_v28  ;;  %v1077_v33 = vmax.f32 %v883_v29, 0.0  ;;  %v1109_v34 = vmax.f32 %v1011_v30, 0.0 }
 0x149   : > { %v885_v35 = vpop.f32.mrf.mxu0  ;;  %v1013_v36 = vpop.f32.mrf.mxu1 }
 0x14a   : > { %v1750_v37 = vpack.c.bf16 %v1077_v33, %v1077_v33  ;;  %v1782_v38 = vpack.c.bf16 %v1109_v34, %v1109_v34  ;;  %v886_v39 = vadd.f32 %v2147_v15, %v885_v35  ;;  %v1014_v40 = vadd.f32 %v2147_v15, %v1013_v36 }
 0x14b   : > { %v887_v41 = vpop.f32.mrf.mxu0  ;;  %v1015_v42 = vpop.f32.mrf.mxu1 }
 0x14c   : > { %1398 = vst.msk [vmem:[%s2155_s23 + $0x50] sm:$0xf] %vm1377_vm3, %v1750_v37  ;;  %1430 = vst.msk [vmem:[%s2155_s23 + $0xd0] sm:$0xf] %vm1377_vm3, %v1782_v38  ;;  %v1078_v43 = vmax.f32 %v886_v39, 0.0  ;;  %v1110_v44 = vmax.f32 %v1014_v40, 0.0 }
 0x14d   : > { %v890_v45 = vpop.f32.mrf.mxu0  ;;  %v1018_v46 = vpop.f32.mrf.mxu1 }
 0x14e   : > { %v1751_v47 = vpack.c.bf16 %v1078_v43, %v1078_v43  ;;  %v1783_v48 = vpack.c.bf16 %v1110_v44, %v1110_v44  ;;  %v891_v49 = vadd.f32 %v2147_v15, %v890_v45  ;;  %v1019_v50 = vadd.f32 %v2147_v15, %v1018_v46 }
 0x14f   : > { %v892_v51 = vpop.f32.mrf.mxu0  ;;  %v1020_v52 = vpop.f32.mrf.mxu1 }
 0x150   : > { %1399 = vst.msk [vmem:[%s2155_s23 + $0x54] sm:$0xf] %vm1377_vm3, %v1751_v47  ;;  %1431 = vst.msk [vmem:[%s2155_s23 + $0xd4] sm:$0xf] %vm1377_vm3, %v1783_v48  ;;  %v1079_v53 = vmax.f32 %v891_v49, 0.0  ;;  %v1111_v54 = vmax.f32 %v1019_v50, 0.0 }
 0x151   : > { %v893_v55 = vpop.f32.mrf.mxu0  ;;  %v1021_v56 = vpop.f32.mrf.mxu1 }
 0x152   : > { %v1752_v57 = vpack.c.bf16 %v1079_v53, %v1079_v53  ;;  %v1784_v58 = vpack.c.bf16 %v1111_v54, %v1111_v54  ;;  %v894_v59 = vadd.f32 %v2147_v15, %v893_v55  ;;  %v1022_v60 = vadd.f32 %v2147_v15, %v1021_v56 }
 0x153   : > { %v895_v61 = vpop.f32.mrf.mxu0  ;;  %v1023_v62 = vpop.f32.mrf.mxu1 }
 0x154   : > { %1400 = vst.msk [vmem:[%s2155_s23 + $0x58] sm:$0xf] %vm1377_vm3, %v1752_v57  ;;  %1432 = vst.msk [vmem:[%s2155_s23 + $0xd8] sm:$0xf] %vm1377_vm3, %v1784_v58  ;;  %v1080_v63 = vmax.f32 %v894_v59, 0.0  ;;  %v1112_v0 = vmax.f32 %v1022_v60, 0.0 }
 0x155   : > { %v898_v1 = vpop.f32.mrf.mxu0  ;;  %v1026_v2 = vpop.f32.mrf.mxu1 }
 0x156   : > { %v1753_v3 = vpack.c.bf16 %v1080_v63, %v1080_v63  ;;  %v1785_v4 = vpack.c.bf16 %v1112_v0, %v1112_v0  ;;  %v899_v5 = vadd.f32 %v2147_v15, %v898_v1  ;;  %v1027_v6 = vadd.f32 %v2147_v15, %v1026_v2 }
 0x157   : > { %v900_v7 = vpop.f32.mrf.mxu0  ;;  %v1028_v8 = vpop.f32.mrf.mxu1 }
 0x158   : > { %1401 = vst.msk [vmem:[%s2155_s23 + $0x5c] sm:$0xf] %vm1377_vm3, %v1753_v3  ;;  %1433 = vst.msk [vmem:[%s2155_s23 + $0xdc] sm:$0xf] %vm1377_vm3, %v1785_v4  ;;  %v1081_v9 = vmax.f32 %v899_v5, 0.0  ;;  %v1113_v10 = vmax.f32 %v1027_v6, 0.0 }
 0x159   : > { %v901_v11 = vpop.f32.mrf.mxu0  ;;  %v1029_v12 = vpop.f32.mrf.mxu1 }
 0x15a   : > { %v1754_v13 = vpack.c.bf16 %v1081_v9, %v1081_v9  ;;  %v1786_v14 = vpack.c.bf16 %v1113_v10, %v1113_v10  ;;  %v902_v16 = vadd.f32 %v2147_v15, %v901_v11  ;;  %v1030_v17 = vadd.f32 %v2147_v15, %v1029_v12 }
 0x15b   : > { %v903_v18 = vpop.f32.mrf.mxu0  ;;  %v1031_v19 = vpop.f32.mrf.mxu1 }
 0x15c   : > { %1402 = vst.msk [vmem:[%s2155_s23 + $0x60] sm:$0xf] %vm1377_vm3, %v1754_v13  ;;  %1434 = vst.msk [vmem:[%s2155_s23 + $0xe0] sm:$0xf] %vm1377_vm3, %v1786_v14  ;;  %v1082_v20 = vmax.f32 %v902_v16, 0.0  ;;  %v1114_v21 = vmax.f32 %v1030_v17, 0.0 }
 0x15d   : > { %v906_v22 = vpop.f32.mrf.mxu0  ;;  %v1034_v23 = vpop.f32.mrf.mxu1 }
 0x15e   : > { %v1755_v24 = vpack.c.bf16 %v1082_v20, %v1082_v20  ;;  %v1787_v25 = vpack.c.bf16 %v1114_v21, %v1114_v21  ;;  %v907_v26 = vadd.f32 %v2147_v15, %v906_v22  ;;  %v1035_v27 = vadd.f32 %v2147_v15, %v1034_v23 }
 0x15f   : > { %v908_v28 = vpop.f32.mrf.mxu0  ;;  %v1036_v29 = vpop.f32.mrf.mxu1 }
 0x160   : > { %1403 = vst.msk [vmem:[%s2155_s23 + $0x64] sm:$0xf] %vm1377_vm3, %v1755_v24  ;;  %1435 = vst.msk [vmem:[%s2155_s23 + $0xe4] sm:$0xf] %vm1377_vm3, %v1787_v25  ;;  %v1083_v30 = vmax.f32 %v907_v26, 0.0  ;;  %v1115_v31 = vmax.f32 %v1035_v27, 0.0 }
 0x161   : > { %v909_v32 = vpop.f32.mrf.mxu0  ;;  %v1037_v33 = vpop.f32.mrf.mxu1 }
 0x162   : > { %v1756_v34 = vpack.c.bf16 %v1083_v30, %v1083_v30  ;;  %v1788_v35 = vpack.c.bf16 %v1115_v31, %v1115_v31  ;;  %v910_v36 = vadd.f32 %v2147_v15, %v909_v32  ;;  %v1038_v37 = vadd.f32 %v2147_v15, %v1037_v33 }
 0x163   : > { %v911_v38 = vpop.f32.mrf.mxu0  ;;  %v1039_v39 = vpop.f32.mrf.mxu1 }
 0x164   : > { %1404 = vst.msk [vmem:[%s2155_s23 + $0x68] sm:$0xf] %vm1377_vm3, %v1756_v34  ;;  %1436 = vst.msk [vmem:[%s2155_s23 + $0xe8] sm:$0xf] %vm1377_vm3, %v1788_v35  ;;  %v1084_v40 = vmax.f32 %v910_v36, 0.0  ;;  %v1116_v41 = vmax.f32 %v1038_v37, 0.0 }
 0x165   : > { %v914_v42 = vpop.f32.mrf.mxu0  ;;  %v1042_v43 = vpop.f32.mrf.mxu1 }
 0x166   : > { %v1757_v44 = vpack.c.bf16 %v1084_v40, %v1084_v40  ;;  %v1789_v45 = vpack.c.bf16 %v1116_v41, %v1116_v41  ;;  %v915_v46 = vadd.f32 %v2147_v15, %v914_v42  ;;  %v1043_v47 = vadd.f32 %v2147_v15, %v1042_v43 }
 0x167   : > { %v916_v48 = vpop.f32.mrf.mxu0  ;;  %v1044_v49 = vpop.f32.mrf.mxu1 }
 0x168   : > { %1405 = vst.msk [vmem:[%s2155_s23 + $0x6c] sm:$0xf] %vm1377_vm3, %v1757_v44  ;;  %1437 = vst.msk [vmem:[%s2155_s23 + $0xec] sm:$0xf] %vm1377_vm3, %v1789_v45  ;;  %v1085_v50 = vmax.f32 %v915_v46, 0.0  ;;  %v1117_v51 = vmax.f32 %v1043_v47, 0.0 }
 0x169   : > { %v917_v52 = vpop.f32.mrf.mxu0  ;;  %v1045_v53 = vpop.f32.mrf.mxu1 }
 0x16a   : > { %v1758_v54 = vpack.c.bf16 %v1085_v50, %v1085_v50  ;;  %v1790_v55 = vpack.c.bf16 %v1117_v51, %v1117_v51  ;;  %v918_v56 = vadd.f32 %v2147_v15, %v917_v52  ;;  %v1046_v57 = vadd.f32 %v2147_v15, %v1045_v53 }
 0x16b   : > { %v919_v58 = vpop.f32.mrf.mxu0  ;;  %v1047_v59 = vpop.f32.mrf.mxu1 }
 0x16c   : > { %1406 = vst.msk [vmem:[%s2155_s23 + $0x70] sm:$0xf] %vm1377_vm3, %v1758_v54  ;;  %1438 = vst.msk [vmem:[%s2155_s23 + $0xf0] sm:$0xf] %vm1377_vm3, %v1790_v55  ;;  %v1086_v60 = vmax.f32 %v918_v56, 0.0  ;;  %v1118_v61 = vmax.f32 %v1046_v57, 0.0 }
 0x16d   : > { %v922_v62 = vpop.f32.mrf.mxu0  ;;  %v1050_v63 = vpop.f32.mrf.mxu1 }
 0x16e   : > { %v1759_v0 = vpack.c.bf16 %v1086_v60, %v1086_v60  ;;  %v1791_v1 = vpack.c.bf16 %v1118_v61, %v1118_v61  ;;  %v923_v2 = vadd.f32 %v2147_v15, %v922_v62  ;;  %v1051_v3 = vadd.f32 %v2147_v15, %v1050_v63 }
 0x16f   : > { %v924_v4 = vpop.f32.mrf.mxu0  ;;  %v1052_v5 = vpop.f32.mrf.mxu1 }
 0x170   : > { %1407 = vst.msk [vmem:[%s2155_s23 + $0x74] sm:$0xf] %vm1377_vm3, %v1759_v0  ;;  %1439 = vst.msk [vmem:[%s2155_s23 + $0xf4] sm:$0xf] %vm1377_vm3, %v1791_v1  ;;  %v1087_v6 = vmax.f32 %v923_v2, 0.0  ;;  %v1119_v7 = vmax.f32 %v1051_v3, 0.0 }
 0x171   : > { %v925_v8 = vpop.f32.mrf.mxu0  ;;  %v1053_v9 = vpop.f32.mrf.mxu1 }
 0x172   : > { %v1760_v10 = vpack.c.bf16 %v1087_v6, %v1087_v6  ;;  %v1792_v11 = vpack.c.bf16 %v1119_v7, %v1119_v7  ;;  %v926_v12 = vadd.f32 %v2147_v15, %v925_v8  ;;  %v1054_v13 = vadd.f32 %v2147_v15, %v1053_v9 }
 0x173   : > { %v927_v14 = vpop.f32.mrf.mxu0  ;;  %v1055_v16 = vpop.f32.mrf.mxu1 }
 0x174   : > { %1408 = vst.msk [vmem:[%s2155_s23 + $0x78] sm:$0xf] %vm1377_vm3, %v1760_v10  ;;  %1440 = vst.msk [vmem:[%s2155_s23 + $0xf8] sm:$0xf] %vm1377_vm3, %v1792_v11  ;;  %v1088_v17 = vmax.f32 %v926_v12, 0.0  ;;  %v1120_v18 = vmax.f32 %v1054_v13, 0.0 }
 0x176   : > { %v1761_v19 = vpack.c.bf16 %v1088_v17, %v1088_v17  ;;  %v1793_v20 = vpack.c.bf16 %v1120_v18, %v1120_v18 }
 0x178   : > { %1409 = vst.msk [vmem:[%s2155_s23 + $0x7c] sm:$0xf] %vm1377_vm3, %v1761_v19  ;;  %1441 = vst.msk [vmem:[%s2155_s23 + $0xfc] sm:$0xf] %vm1377_vm3, %v1793_v20 }
 0x179 PF: > { %s13_s14 = sadd.s32 1, %s1968_s14   ;;  %s2360_s12 = smov %s1964_s13 }
 0x17a   : > { %p10_p5 = scmp.ge.s32.totalorder %s13_s14, 6   ;;  %s2361_s13 = smov %s2363_s15 }
 0x17c   :  { %12 = sbr.rel (!%p10_p5) target bundleno = 2 (0x2), region = 68 }

</bundles_post_ra>
